<compile_context>
chip_gen: v6e
topology: v6e:2x2x1
jax: 0.10.0
libtpu: 0.0.40
codegen_flags: <defaults>
</compile_context>

<pallas_src>
import functools
from typing import NamedTuple

import jax
import jax.numpy as jnp
from jax.experimental import pallas as pl
from jax.experimental.pallas import tpu as pltpu


def _round_up(x: int, m: int) -> int:
    return ((x + m - 1) // m) * m


class HeadMeta(NamedTuple):
    """Static (hashable) shape metadata for the classifier head."""
    F: int    # out_feature (per-branch K dim, unpadded)
    M: int    # mid_nn_layer (unpadded)
    O: int    # output_dim (unpadded)
    Mp: int   # padded hidden dim (lane-dense)
    Op: int   # padded output dim (lane-dense, 128)


# --------------------------------------------------------------------------
# Kernel: fused concat + Linear + ReLU + Linear.
# x1/x2 arrive as f32 tiles and are cast to the weight compute dtype in-kernel
# (the cast hides on the VPU slot under the MXU / DMA); the concat is never
# materialized: concat([x1,x2]) @ W1 == x1 @ W1[:F] + x2 @ W1[F:].
# --------------------------------------------------------------------------
def _classifier_kernel(x1_ref, x2_ref, w1a_ref, w1b_ref, b1_ref,
                       w2_ref, b2_ref, o_ref):
    """x1/x2: (TB, F) f32, w1a/w1b: (F, Mp) bf16, b1: (1, Mp) f32,
    w2: (Mp, Op) bf16, b2: (1, Op) f32, o: (TB, Op) f32."""
    cdt = w1a_ref.dtype

    x1 = x1_ref[...].astype(cdt)
    x2 = x2_ref[...].astype(cdt)

    h = jnp.dot(x1, w1a_ref[...], preferred_element_type=jnp.float32)
    h = h + jnp.dot(x2, w1b_ref[...], preferred_element_type=jnp.float32)
    # bias-add + ReLU kept in float32 (no bf16 VPU on v5e; cost hides under MXU).
    h = jnp.maximum(h + b1_ref[...], 0.0)

    y = jnp.dot(h.astype(cdt), w2_ref[...], preferred_element_type=jnp.float32)
    o_ref[...] = (y + b2_ref[...]).astype(o_ref.dtype)


# --------------------------------------------------------------------------
# One-time parameter preparation (hoisted out of the per-call path).
# Returns (weights: dict of arrays only, meta: hashable static NamedTuple).
# --------------------------------------------------------------------------
def prepare_params(params, *, out_feature, compute_dtype=jnp.bfloat16,
                   m_align=128, n_align=128):
    w1, b1, w2, b2 = params["w1"], params["b1"], params["w2"], params["b2"]
    F = out_feature
    assert w1.shape[0] == 2 * F, "W1 rows must equal 2*out_feature (split=True)"
    M = w1.shape[1]
    O = w2.shape[1]

    Mp = _round_up(M, m_align)
    Op = _round_up(O, n_align)   # 128 is enough: one lane-dense tile for O=5

    # K (rows of W1) stays at F: full-dim blocks, MXU handles the ragged tail.
    w1a = jnp.pad(w1[:F, :], ((0, 0), (0, Mp - M))).astype(compute_dtype)
    w1b = jnp.pad(w1[F:, :], ((0, 0), (0, Mp - M))).astype(compute_dtype)
    b1p = jnp.pad(b1.reshape(1, M), ((0, 0), (0, Mp - M))).astype(jnp.float32)
    w2p = jnp.pad(w2, ((0, Mp - M), (0, Op - O))).astype(compute_dtype)
    b2p = jnp.pad(b2.reshape(1, O), ((0, 0), (0, Op - O))).astype(jnp.float32)

    weights = {"w1a": w1a, "w1b": w1b, "b1": b1p, "w2": w2p, "b2": b2p}
    meta = HeadMeta(F=F, M=M, O=O, Mp=Mp, Op=Op)
    return weights, meta


# --------------------------------------------------------------------------
# Forward wrapper.  `weights` is an array-only pytree (traced); `meta` and
# `block_b` are static.
# --------------------------------------------------------------------------
@functools.partial(jax.jit, static_argnames=("meta", "block_b"))
def image_pretrained_model_forward(x1, x2, weights, *, meta, block_b=256):
    """Pallas forward matching Image_PreTrained_Model (split=True, pre_loaded=True)."""
    w1a, w1b = weights["w1a"], weights["w1b"]
    b1, w2, b2 = weights["b1"], weights["w2"], weights["b2"]
    F, O, Mp, Op = meta.F, meta.O, meta.Mp, meta.Op

    B = x1.shape[0]
    assert x1.shape == (B, F) and x2.shape == (B, F)

    # Batch tiling: multiple of 16 (bf16 sublane pack) once B > 16, capped at
    # block_b (<= 1024 on v7x to respect the 32 MiB scoped-VMEM default).
    if B <= 16:
        tb = _round_up(B, 8)
    else:
        tb = min(_round_up(B, 16), block_b)
    Bp = _round_up(B, tb)
    nb = Bp // tb

    # Only batch-dim pad (no K pad, no external dtype cast pass).
    if Bp != B:
        x1 = jnp.pad(x1, ((0, Bp - B), (0, 0)))
        x2 = jnp.pad(x2, ((0, Bp - B), (0, 0)))

    # Batch-aware core sharding: at small B the call is bound by the weight
    # DMA and splitting across TensorCores would duplicate the weight fetch;
    # only mark the batch axis parallel when B is large enough to be
    # compute/activation-bound.  (On v7x, pltpu.CORE_PARALLEL could be used
    # here instead of "parallel" for explicit dual-TC codegen.)
    semantics = ("parallel",) if (nb >= 2 and B >= 512) else ("arbitrary",)

    out_padded = pl.pallas_call(
        _classifier_kernel,
        out_shape=jax.ShapeDtypeStruct((Bp, Op), jnp.float32),
        grid_spec=pltpu.PrefetchScalarGridSpec(
            num_scalar_prefetch=0,
            grid=(nb,),
            in_specs=[
                pl.BlockSpec((tb, F), lambda i: (i, 0)),    # x1 tile (f32)
                pl.BlockSpec((tb, F), lambda i: (i, 0)),    # x2 tile (f32)
                pl.BlockSpec((F, Mp), lambda i: (0, 0)),    # W1 top half (resident)
                pl.BlockSpec((F, Mp), lambda i: (0, 0)),    # W1 bottom half (resident)
                pl.BlockSpec((1, Mp), lambda i: (0, 0)),    # b1 (resident)
                pl.BlockSpec((Mp, Op), lambda i: (0, 0)),   # W2 (resident)
                pl.BlockSpec((1, Op), lambda i: (0, 0)),    # b2 (resident)
            ],
            out_specs=pl.BlockSpec((tb, Op), lambda i: (i, 0)),
        ),
        compiler_params=pltpu.CompilerParams(dimension_semantics=semantics),
    )(x1, x2, w1a, w1b, b1, w2, b2)

    return out_padded[:B, :O]


# --------------------------------------------------------------------------
# Param init + reference (mirrors the kernel's bf16 operand quantization).
# --------------------------------------------------------------------------
def init_params(key, out_feature, mid_nn_layer, output_dim):
    """torch.nn.Linear-style init: U(-1/sqrt(fan_in), +1/sqrt(fan_in))."""
    k1, k2, k3, k4 = jax.random.split(key, 4)
    in1 = 2 * out_feature
    bound1 = 1.0 / jnp.sqrt(in1)
    bound2 = 1.0 / jnp.sqrt(mid_nn_layer)
    w1 = jax.random.uniform(k1, (in1, mid_nn_layer), jnp.float32, -bound1, bound1)
    b1 = jax.random.uniform(k2, (mid_nn_layer,), jnp.float32, -bound1, bound1)
    w2 = jax.random.uniform(k3, (mid_nn_layer, output_dim), jnp.float32, -bound2, bound2)
    b2 = jax.random.uniform(k4, (output_dim,), jnp.float32, -bound2, bound2)
    return {"w1": w1, "b1": b1, "w2": w2, "b2": b2}


def _reference(x1, x2, params, compute_dtype=jnp.bfloat16):
    x = jnp.concatenate([x1, x2], axis=-1).astype(compute_dtype)
    h = jnp.dot(x, params["w1"].astype(compute_dtype),
                preferred_element_type=jnp.float32) + params["b1"]
    h = jnp.maximum(h, 0.0)
    y = jnp.dot(h.astype(compute_dtype), params["w2"].astype(compute_dtype),
                preferred_element_type=jnp.float32) + params["b2"]
    return y


if __name__ == "__main__":
    # Small synthetic shapes consistent with the pre_loaded/split forward:
    # x1, x2 are backbone feature vectors of size `out_feature` each.
    # (Real config: out_feature=1000, mid=512, output_dim=5 — same code path,
    #  the padding simply lands on Mp=512 / Op=128.)
    B = 8
    OUT_FEATURE = 40      # deliberately not a multiple of 128 -> ragged-K path
    MID = 64
    OUTPUT_DIM = 5

    key = jax.random.PRNGKey(0)
    kx1, kx2, kp = jax.random.split(key, 3)
    x1 = jax.random.normal(kx1, (B, OUT_FEATURE), jnp.float32)
    x2 = jax.random.normal(kx2, (B, OUT_FEATURE), jnp.float32)
    params = init_params(kp, OUT_FEATURE, MID, OUTPUT_DIM)

    weights, meta = prepare_params(params, out_feature=OUT_FEATURE)

    y = image_pretrained_model_forward(x1, x2, weights, meta=meta)
    y = jax.block_until_ready(y)

    y_ref = _reference(x1, x2, params)
    assert y.shape == (B, OUTPUT_DIM)
    assert jnp.allclose(y, y_ref, atol=5e-3, rtol=5e-3), "mismatch vs reference"

    print("KERNEL_OK")
</pallas_src>

<mosaic_0001>
module attributes {stable_mosaic.version = 11 : i64} {
  func.func @_classifier_kernel(%arg0: i32, %arg1: memref<8x40xf32, #tpu.memory_space<vmem>>, %arg2: memref<8x40xf32, #tpu.memory_space<vmem>>, %arg3: memref<40x128xbf16, #tpu.memory_space<vmem>>, %arg4: memref<40x128xbf16, #tpu.memory_space<vmem>>, %arg5: memref<1x128xf32, #tpu.memory_space<vmem>>, %arg6: memref<128x128xbf16, #tpu.memory_space<vmem>>, %arg7: memref<1x128xf32, #tpu.memory_space<vmem>>, %arg8: memref<8x128xf32, #tpu.memory_space<vmem>>) attributes {dimension_semantics = [#tpu.dimension_semantics<arbitrary>], iteration_bounds = array<i64: 1>, scalar_prefetch = 0 : i64, scratch_operands = 0 : i64, tpu.core_type = #tpu.core_type<tc>, window_params = [{transform_indices = @transform_0, window_bounds = array<i64: 8, 40>}, {transform_indices = @transform_1, window_bounds = array<i64: 8, 40>}, {pipeline_mode = #tpu.pipeline_mode<synchronous>, transform_indices = @transform_2, window_bounds = array<i64: 40, 128>}, {pipeline_mode = #tpu.pipeline_mode<synchronous>, transform_indices = @transform_3, window_bounds = array<i64: 40, 128>}, {pipeline_mode = #tpu.pipeline_mode<synchronous>, transform_indices = @transform_4, window_bounds = array<i64: 1, 128>}, {pipeline_mode = #tpu.pipeline_mode<synchronous>, transform_indices = @transform_5, window_bounds = array<i64: 128, 128>}, {pipeline_mode = #tpu.pipeline_mode<synchronous>, transform_indices = @transform_6, window_bounds = array<i64: 1, 128>}, {transform_indices = @transform_7, window_bounds = array<i64: 8, 128>}]} {
    %c0 = arith.constant 0 : index
    %c0_0 = arith.constant 0 : index
    %0 = vector.load %arg1[%c0, %c0_0] : memref<8x40xf32, #tpu.memory_space<vmem>>, vector<8x40xf32>
    %1 = arith.truncf %0 : vector<8x40xf32> to vector<8x40xbf16>
    %c0_1 = arith.constant 0 : index
    %c0_2 = arith.constant 0 : index
    %2 = vector.load %arg2[%c0_1, %c0_2] : memref<8x40xf32, #tpu.memory_space<vmem>>, vector<8x40xf32>
    %3 = arith.truncf %2 : vector<8x40xf32> to vector<8x40xbf16>
    %c0_3 = arith.constant 0 : index
    %c0_4 = arith.constant 0 : index
    %4 = vector.load %arg3[%c0_3, %c0_4] : memref<40x128xbf16, #tpu.memory_space<vmem>>, vector<40x128xbf16>
    %cst = arith.constant dense<0.000000e+00> : vector<8x128xf32>
    %5 = tpu.matmul %1, %4, %cst {dimension_numbers = #tpu.dot_dimension_numbers<[1], [0], [0], [1], [0, 0, 1, 1], [], []>} : vector<8x40xbf16>, vector<40x128xbf16>, vector<8x128xf32> -> vector<8x128xf32>
    %c0_5 = arith.constant 0 : index
    %c0_6 = arith.constant 0 : index
    %6 = vector.load %arg4[%c0_5, %c0_6] : memref<40x128xbf16, #tpu.memory_space<vmem>>, vector<40x128xbf16>
    %cst_7 = arith.constant dense<0.000000e+00> : vector<8x128xf32>
    %7 = tpu.matmul %3, %6, %cst_7 {dimension_numbers = #tpu.dot_dimension_numbers<[1], [0], [0], [1], [0, 0, 1, 1], [], []>} : vector<8x40xbf16>, vector<40x128xbf16>, vector<8x128xf32> -> vector<8x128xf32>
    %8 = arith.addf %5, %7 : vector<8x128xf32>
    %c0_8 = arith.constant 0 : index
    %c0_9 = arith.constant 0 : index
    %9 = vector.load %arg5[%c0_8, %c0_9] : memref<1x128xf32, #tpu.memory_space<vmem>>, vector<1x128xf32>
    %10 = vector.broadcast %9 : vector<1x128xf32> to vector<8x128xf32>
    %11 = arith.addf %8, %10 : vector<8x128xf32>
    %cst_10 = arith.constant 0.000000e+00 : f32
    %12 = vector.broadcast %cst_10 : f32 to vector<8x128xf32>
    %13 = arith.maximumf %11, %12 : vector<8x128xf32>
    %14 = arith.truncf %13 : vector<8x128xf32> to vector<8x128xbf16>
    %c0_11 = arith.constant 0 : index
    %c0_12 = arith.constant 0 : index
    %15 = vector.load %arg6[%c0_11, %c0_12] : memref<128x128xbf16, #tpu.memory_space<vmem>>, vector<128x128xbf16>
    %cst_13 = arith.constant dense<0.000000e+00> : vector<8x128xf32>
    %16 = tpu.matmul %14, %15, %cst_13 {dimension_numbers = #tpu.dot_dimension_numbers<[1], [0], [0], [1], [0, 0, 1, 1], [], []>} : vector<8x128xbf16>, vector<128x128xbf16>, vector<8x128xf32> -> vector<8x128xf32>
    %c0_14 = arith.constant 0 : index
    %c0_15 = arith.constant 0 : index
    %17 = vector.load %arg7[%c0_14, %c0_15] : memref<1x128xf32, #tpu.memory_space<vmem>>, vector<1x128xf32>
    %18 = vector.broadcast %17 : vector<1x128xf32> to vector<8x128xf32>
    %19 = arith.addf %16, %18 : vector<8x128xf32>
    %c0_16 = arith.constant 0 : index
    %c0_17 = arith.constant 0 : index
    %20 = vector.load %arg8[%c0_16, %c0_17] : memref<8x128xf32, #tpu.memory_space<vmem>>, vector<8x128xf32>
    tpu.vector_store %arg8[%c0_16, %c0_17], %19 {strides = array<i32>} : memref<8x128xf32, #tpu.memory_space<vmem>>, vector<8x128xf32>,
    return
  }
  func.func @transform_0(%arg0: i32) -> (i32, i32) {
    %c0_i32 = arith.constant 0 : i32
    %c0_i32_0 = arith.constant 0 : i32
    return %arg0, %c0_i32 : i32, i32
  }
  func.func @transform_1(%arg0: i32) -> (i32, i32) {
    %c0_i32 = arith.constant 0 : i32
    %c0_i32_0 = arith.constant 0 : i32
    return %arg0, %c0_i32 : i32, i32
  }
  func.func @transform_2(%arg0: i32) -> (i32, i32) {
    %c0_i32 = arith.constant 0 : i32
    %c0_i32_0 = arith.constant 0 : i32
    %c0_i32_1 = arith.constant 0 : i32
    return %c0_i32, %c0_i32_0 : i32, i32
  }
  func.func @transform_3(%arg0: i32) -> (i32, i32) {
    %c0_i32 = arith.constant 0 : i32
    %c0_i32_0 = arith.constant 0 : i32
    %c0_i32_1 = arith.constant 0 : i32
    return %c0_i32, %c0_i32_0 : i32, i32
  }
  func.func @transform_4(%arg0: i32) -> (i32, i32) {
    %c0_i32 = arith.constant 0 : i32
    %c0_i32_0 = arith.constant 0 : i32
    %c0_i32_1 = arith.constant 0 : i32
    return %c0_i32, %c0_i32_0 : i32, i32
  }
  func.func @transform_5(%arg0: i32) -> (i32, i32) {
    %c0_i32 = arith.constant 0 : i32
    %c0_i32_0 = arith.constant 0 : i32
    %c0_i32_1 = arith.constant 0 : i32
    return %c0_i32, %c0_i32_0 : i32, i32
  }
  func.func @transform_6(%arg0: i32) -> (i32, i32) {
    %c0_i32 = arith.constant 0 : i32
    %c0_i32_0 = arith.constant 0 : i32
    %c0_i32_1 = arith.constant 0 : i32
    return %c0_i32, %c0_i32_0 : i32, i32
  }
  func.func @transform_7(%arg0: i32) -> (i32, i32) {
    %c0_i32 = arith.constant 0 : i32
    %c0_i32_0 = arith.constant 0 : i32
    return %arg0, %c0_i32 : i32, i32
  }
}

</mosaic_0001>

<bundles_post_ra>
// kernel: image_pretrained_model_forward.1
= control target key start
LH: loop header
LB: loop body
LE: loop exit
PB: predicated region body
PF: predicated region fallthrough
CT: control target
= control target key end

     0   :  { %12 = vsyncpa [#allocation3], 0  ;;  %s686_s0 = inlined_call_operand.hbm [shape: f32[8,40], index: 0, kind: input, shape index: {}]   ;;  %s687_s1 = inlined_call_operand.hbm [shape: f32[8,40], index: 1, kind: input, shape index: {}]   ;;  %s688_s2 = inlined_call_operand.hbm [shape: bf16[40,128], index: 2, kind: input, shape index: {}]   ;;  %s689_s3 = inlined_call_operand.hbm [shape: bf16[40,128], index: 3, kind: input, shape index: {}]   ;;  %s690_s4 = inlined_call_operand.vmem [shape: f32[1,128], index: 4, kind: input, shape index: {}]   ;;  %s691_s5 = inlined_call_operand.hbm [shape: bf16[128,128], index: 5, kind: input, shape index: {}]   ;;  %s692_s6 = inlined_call_operand.vmem [shape: f32[1,128], index: 6, kind: input, shape index: {}]   ;;  %s693_s7 = inlined_call_operand.hbm [shape: f32[8,128], index: 7, kind: output, shape index: {}]  }
   0x1   :  { %13 = vsyncpa [#allocation6], 0 }
   0x2   :  { %14 = vsyncpa [#allocation9], 0 }
   0x3   :  { %15 = vsyncpa [#allocation4], 0  ;;  %s596_s24 = smov [#allocation5]  }
   0x4   :  { %s32_s25 = sshll.u32 %s596_s24, 4  ;;  %s33_s25 = int_to_ptr.vmem [resolvable:$true] %s32_s25 }
   0x5   :  { %s476_s26 = scalar_lea.vmem %s33_s25, 128  ;;  %p481_p1 = scmp.lt.s32.totalorder %s33_s25, %s33_s25 }
   0x6   :  { %p477_p0 = scmp.ne.s32.totalorder %s33_s25, %s476_s26  ;;  %p482_p2 = scmp.lt.s32.totalorder %s476_s26, %s476_s26 }
   0x8   :  { %p483_p3 = por %p482_p2, %p481_p1 }
   0xa   :  { %p484_p4 = pnand %p483_p3, %p477_p0 }
   0xc   :  { %487 = shalt.err (!%p484_p4)
}
   0xd   :  { %35 = dma.hbm_to_vmem [thread:$0]  %s687_s1, 128, %s33_s25, [#allocation6]  }
   0xe   :  { %s597_s29 = smov [#allocation8]   ;;  %s598_s8 = smov [#allocation2]  }
   0xf   :  { %s53_s30 = sshll.u32 %s597_s29, 4  ;;  %s22_s9 = sshll.u32 %s598_s8, 4  ;;  %s54_s30 = int_to_ptr.vmem [resolvable:$true] %s53_s30  ;;  %s23_s9 = int_to_ptr.vmem [resolvable:$true] %s22_s9 }
  0x10   :  { %s496_s10 = scalar_lea.vmem %s54_s30, 320  ;;  %p501_p6 = scmp.lt.s32.totalorder %s54_s30, %s54_s30 }
  0x11   :  { %p497_p5 = scmp.ne.s32.totalorder %s54_s30, %s496_s10  ;;  %p502_p7 = scmp.lt.s32.totalorder %s496_s10, %s496_s10 }
  0x13   :  { %p503_p8 = por %p502_p7, %p501_p6 }
  0x15   :  { %p504_p9 = pnand %p503_p8, %p497_p5 }
  0x17   :  { %507 = shalt.err (!%p504_p9)
}
  0x18   :  { %s599_s11 = smov 64   ;;  %s600_s12 = smov 4  }
  0x19   :  { %59 = dma.hbm_to_vmem [thread:$0]  %s689_s3, 320, %s54_s30, [#allocation9], %s599_s11, %s599_s11, %s600_s12  }
  0x1a   :  { %s516_s1 = scalar_lea.vmem %s23_s9, 128  ;;  %p521_p11 = scmp.lt.s32.totalorder %s23_s9, %s23_s9 }
  0x1b   :  { %p517_p10 = scmp.ne.s32.totalorder %s23_s9, %s516_s1  ;;  %p522_p12 = scmp.lt.s32.totalorder %s516_s1, %s516_s1 }
  0x1d   :  { %p523_p13 = por %p522_p12, %p521_p11 }
  0x1f   :  { %p524_p0 = pnand %p523_p13, %p517_p10 }
  0x21   :  { %527 = shalt.err (!%p524_p0)
}
  0x22   :  { %25 = dma.hbm_to_vmem [thread:$0]  %s686_s0, 128, %s23_s9, [#allocation3]  }
  0x23   :  { %s601_s17 = smov [#allocation7]   ;;  %s602_s19 = smov [#allocation10]  }
  0x24   :  { %s41_s18 = sshll.u32 %s601_s17, 4  ;;  %s67_s20 = sshll.u32 %s602_s19, 4  ;;  %s42_s18 = int_to_ptr.vmem [resolvable:$true] %s41_s18  ;;  %s68_s20 = int_to_ptr.vmem [resolvable:$true] %s67_s20 }
  0x25   :  { %s536_s21 = scalar_lea.vmem %s42_s18, 320  ;;  %p541_p2 = scmp.lt.s32.totalorder %s42_s18, %s42_s18 }
  0x26   :  { %p537_p1 = scmp.ne.s32.totalorder %s42_s18, %s536_s21  ;;  %p542_p3 = scmp.lt.s32.totalorder %s536_s21, %s536_s21 }
  0x28   :  { %p543_p4 = por %p542_p3, %p541_p2 }
  0x2a   :  { %p544_p5 = pnand %p543_p4, %p537_p1 }
  0x2c   :  { %547 = shalt.err (!%p544_p5)
}
  0x2d   :  { %47 = dma.hbm_to_vmem [thread:$0]  %s688_s2, 320, %s42_s18, [#allocation6], %s599_s11, %s599_s11, %s600_s12  }
  0x2e   :  { %s556_s0 = scalar_lea.vmem %s68_s20, 1024  ;;  %p561_p7 = scmp.lt.s32.totalorder %s68_s20, %s68_s20 }
  0x2f   :  { %p557_p6 = scmp.ne.s32.totalorder %s68_s20, %s556_s0  ;;  %p562_p8 = scmp.lt.s32.totalorder %s556_s0, %s556_s0 }
  0x31   :  { %p563_p9 = por %p562_p8, %p561_p7 }
  0x33   :  { %p564_p10 = pnand %p563_p9, %p557_p6 }
  0x35   :  { %567 = shalt.err (!%p564_p10)
}
  0x36   :  { %73 = dma.hbm_to_vmem [thread:$0]  %s691_s5, 1024, %s68_s20, [#allocation9], %s599_s11, %s599_s11, %s600_s12  }
  0x37   :  { %588 = dma.done.wait [#allocation3], 128  }
  0x38   :  { %589 = vsyncadd [#allocation3], 4294967168 }
  0x39   :  { %590 = dma.done.wait [#allocation6], 448  }
  0x3a   :  { %591 = vsyncadd [#allocation6], 4294966848 }
  0x3b   :  { %592 = dma.done.wait [#allocation9], 1344  }
  0x3c   :  { %593 = vsyncadd [#allocation9], 4294965952  ;;  %v603_v0 = vmov 0.0   ;;  %vm604_vm0 = vmmov 0   ;;  %vm125_vm1 = vcmask 1043456   ;;  %v456_v3 = vld [vmem:[#allocation8 + $0x8] sm:$0xff]  }
  0x3d   :  { %404 = vmatprep.subr.bf16.mxu1 %v603_v0  ;;  %410 = vmatprep.mubr.msk.bf16.mxu1 %vm604_vm0, %v603_v0  ;;  %v454_v1 = vld [vmem:[#allocation8 + $0x10] ss:$0 sps:$4 sm:$0xff]   ;;  %v457_v4 = vld [vmem:[#allocation8] sm:$0xff]   ;;  %v455_v5 = vld [vmem:[#allocation7 + $0x10] ss:$0 sps:$4 sm:$0xff]   ;;  %vm121_vm2 = vcmask 326656  }
  0x3e   :  { %424 = vmatprep.subr.bf16.mxu0 %v603_v0  ;;  %440 = vmatprep.mubr.msk.bf16.mxu0 %vm604_vm0, %v603_v0  ;;  %v127_v2 = vsel %vm125_vm1, %v454_v1, 0  ;;  %v460_v6 = vld [vmem:[#allocation10 + $0x38] sm:$0xff]   ;;  %v94_v7 = vld [vmem:[#allocation5] sm:$0xff]  ;;  %v188_v10 = vsel %vm125_vm1, %v455_v5, 0  ;;  %v462_v11 = vld [vmem:[#allocation10 + $0x28] sm:$0xff]   ;;  %s605_s27 = smov [#allocation11]  }
  0x3f   :  { %405 = vmatpush3.bf16.msra.mxu1 %v127_v2  ;;  %425 = vmatpush3.bf16.msra.mxu0 %v460_v6  ;;  %v461_v8 = vld [vmem:[#allocation10 + $0x30] sm:$0xff]   ;;  %v95_v9 = vpack.c.bf16 %v94_v7, %v94_v7  ;;  %v458_v12 = vld [vmem:[#allocation7 + $0x8] sm:$0xff]   ;;  %v459_v13 = vld [vmem:[#allocation7] sm:$0xff]   ;;  %s358_s28 = sshll.u32 %s605_s27, 4  ;;  %s359_s28 = int_to_ptr.vmem [resolvable:$true] %s358_s28 }
  0x40   :  { %406 = vmatprep.subr.bf16.mxu1 %v603_v0  ;;  %426 = vmatprep.subr.bf16.mxu0 %v603_v0  ;;  %v92_v14 = vld [vmem:[#allocation2] sm:$0xff]  ;;  %v463_v16 = vld [vmem:[#allocation10 + $0x20] sm:$0xff]   ;;  %v464_v17 = vld [vmem:[#allocation10 + $0x18] sm:$0xff]   ;;  %p573_p12 = scmp.lt.s32.totalorder %s359_s28, %s359_s28 }
  0x41   :  { %v93_v15 = vpack.c.bf16 %v92_v14, %v92_v14  ;;  %v465_v18 = vld [vmem:[#allocation10 + $0x10] sm:$0xff]   ;;  %v466_v19 = vld [vmem:[#allocation10 + $0x8] sm:$0xff]   ;;  %v467_v20 = vld [vmem:[#allocation10] sm:$0xff]  }
  0x42   :  { %v377_v26 = vld [vmem:[%s690_s4] ss:$0 sm:$0xff]  ;;  %s568_s4 = scalar_lea.vmem %s359_s28, 128 }
  0x43   :  { %407 = vmatpush3.bf16.msra.mxu1 %v456_v3  ;;  %427 = vmatpush3.bf16.msra.mxu0 %v461_v8  ;;  %v378_v34 = vld [vmem:[%s692_s6] ss:$0 sm:$0xff]  ;;  %p569_p11 = scmp.ne.s32.totalorder %s359_s28, %s568_s4  ;;  %p574_p13 = scmp.lt.s32.totalorder %s568_s4, %s568_s4 }
  0x44   :  { %408 = vmatprep.subr.bf16.mxu1 %v603_v0  ;;  %428 = vmatprep.subr.bf16.mxu0 %v603_v0 }
  0x45   :  { %p575_p0 = por %p574_p13, %p573_p12 }
  0x47   :  { %409 = vmatpush3.bf16.msra.mxu1 %v457_v4  ;;  %429 = vmatpush3.bf16.msra.mxu0 %v462_v11  ;;  %p576_p1 = pnand %p575_p0, %p569_p11 }
  0x48   :  { %414 = vmatprep.subr.bf16.mxu1 %v603_v0  ;;  %430 = vmatprep.subr.bf16.mxu0 %v603_v0 }
  0x4a   :  { %411 = vmatmul.mubr.msk.bf16.vlgmr.msra.gmra.mxu1 %vm121_vm2, %v95_v9 }
  0x4b   :  { %415 = vmatpush3.bf16.msra.mxu1 %v188_v10  ;;  %420 = vmatprep.mubr.msk.bf16.mxu1 %vm604_vm0, %v603_v0 }
  0x4c   :  { %416 = vmatprep.subr.bf16.mxu1 %v603_v0  ;;  %431 = vmatpush3.bf16.msra.mxu0 %v463_v16 }
  0x4d   :  { %432 = vmatprep.subr.bf16.mxu0 %v603_v0 }
  0x4f   :  { %417 = vmatpush3.bf16.msra.mxu1 %v458_v12 }
  0x50   :  { %418 = vmatprep.subr.bf16.mxu1 %v603_v0  ;;  %433 = vmatpush3.bf16.msra.mxu0 %v464_v17 }
  0x51   :  { %434 = vmatprep.subr.bf16.mxu0 %v603_v0 }
  0x53   :  { %419 = vmatpush3.bf16.msra.mxu1 %v459_v13 }
  0x54   :  { %435 = vmatpush3.bf16.msra.mxu0 %v465_v18 }
  0x55   :  { %436 = vmatprep.subr.bf16.mxu0 %v603_v0 }
  0x56   :  { %421 = vmatmul.mubr.msk.bf16.vlgmr.msra.gmra.mxu1 %vm121_vm2, %v93_v15 }
  0x58   :  { %437 = vmatpush3.bf16.msra.mxu0 %v466_v19 }
  0x59   :  { %438 = vmatprep.subr.bf16.mxu0 %v603_v0 }
  0x5c   :  { %439 = vmatpush3.bf16.msra.mxu0 %v467_v20 }
 0x10a   :  { %v163_v21 = vpop.f32.mrf.mxu1 }
 0x10c   :  { %v412_v22 = vpop.f32.mrf.mxu1 }
 0x10e   :  { %v166_v23 = vpop.f32.mrf.mxu1 }
 0x110   :  { %v413_v24 = vpop.f32.mrf.mxu1 }
 0x116   :  { %v224_v25 = vpop.f32.mrf.mxu1 }
 0x117   :  { %v225_v27 = vadd.f32 %v224_v25, %v163_v21 }
 0x118   :  { %v422_v28 = vpop.f32.mrf.mxu1 }
 0x119   :  { %v237_v29 = vadd.f32 %v377_v26, %v225_v27 }
 0x11a   :  { %v227_v30 = vpop.f32.mrf.mxu1 }
 0x11b   :  { %v238_v31 = vmax.f32 %v237_v29, 0.0 }
 0x11c   :  { %v423_v32 = vpop.f32.mrf.mxu1 }
 0x11d   :  { %v239_v33 = vpack.c.bf16 %v238_v31, %v238_v31 }
 0x11f   :  { %441 = vmatmul.mubr.bf16.vlgmr.msra.gmra.mxu0 %v239_v33 }
 0x1df   :  { %v345_v35 = vpop.f32.mrf.mxu0 }
 0x1e0   :  { %v346_v36 = vadd.f32 %v378_v34, %v345_v35 }
 0x1e1   :  { %v442_v37 = vpop.f32.mrf.mxu0 }
 0x1e2   :  { %351 = vst [vmem:[#allocation11] sm:$0xff] %v346_v36 }
 0x1e3   :  { %v348_v38 = vpop.f32.mrf.mxu0 }
 0x1e4   :  { %579 = shalt.err (!%p576_p1)
}
 0x1e5   :  { %361 = dma.vmem_to_hbm [thread:$0]  %s359_s28, 128, %s693_s7, [#allocation4]   ;;  %v443_v39 = vpop.f32.mrf.mxu0 }
 0x1e6   :  { %594 = dma.done.wait [#allocation4], 128  }
 0x1e7   :  { %595 = vsyncadd [#allocation4], 4294967168 }
 0x1e8   :  { %365 = vsyncpa [#allocation3], 1 }
 0x1e9   :  { %366 = vsyncpa [#allocation6], 1 }
 0x1ea   :  { %367 = vsyncpa [#allocation9], 1 }
 0x1eb   :  { %368 = vsyncpa [#allocation4], 1 }

</bundles_post_ra>
